<compile_context>
chip_gen: v5e
topology: v5e:2x2
jax: 0.10.0
libtpu: 0.0.40
codegen_flags: <defaults>
</compile_context>

<pallas_src>
import functools
import math

import jax
import jax.numpy as jnp
from jax.experimental import pallas as pl
from jax.experimental.pallas import tpu as pltpu

LANE = 128  # TPU vreg lane width


def eca_kernel_size(c, b=1, gamma=2):
    t = int(abs((math.log(c, 2) + b) / gamma))
    return t if t % 2 else t + 1


def _chip_vmem_params():
    """(block_budget_bytes, vmem_limit_bytes) tuned per TPU generation."""
    try:
        kind = jax.devices()[0].device_kind.lower()
    except Exception:
        kind = ""
    if "v2" in kind or "v3" in kind:                      # 16 MiB VMEM parts
        return 2 << 20, 12 << 20
    if "v4" in kind or "v5" in kind or "v6" in kind:      # 128 MiB VMEM parts
        return 16 << 20, 96 << 20
    return 8 << 20, 48 << 20                              # v7x / unknown (64 MiB VMEM)


# ---------------------------------------------------------------------------
# Fused single-pass kernel: sums -> k-tap conv -> sigmoid -> multiply.
# ---------------------------------------------------------------------------
def _shifted_channels(y, d, C):
    """z[c] = y[c + d] if 0 <= c + d < C else 0, for a (C, 1) fp32 column."""
    if d == 0:
        return y
    if abs(d) >= C:
        return jnp.zeros_like(y)
    zeros = jnp.zeros((abs(d), 1), y.dtype)
    if d > 0:
        return jnp.concatenate([y[d:, :], zeros], axis=0)
    return jnp.concatenate([zeros, y[: C + d, :]], axis=0)


def _eca_fused_kernel(w_ref, x_ref, o_ref, *, inv_hw, k, pad):
    # w_ref: (k,) float32 in SMEM.  x_ref / o_ref: (C, HW) slab of one batch.
    C = x_ref.shape[0]
    # Spatial mean per channel (fp32 accumulate).
    y = jnp.sum(x_ref[...], axis=-1, keepdims=True, dtype=jnp.float32) * inv_hw
    # k-tap Conv1d over channels with zero padding (cross-correlation, as PyTorch).
    conv = jnp.zeros_like(y)
    for j in range(k):
        conv = conv + w_ref[j] * _shifted_channels(y, j - pad, C)
    # Sigmoid (exp on EUP; exact divide to match the fp32 reference).
    attn = (1.0 / (1.0 + jnp.exp(-conv))).astype(o_ref.dtype)      # (C, 1)
    # Broadcast multiply, one VPU op per element in the input dtype.
    o_ref[...] = x_ref[...] * attn


# ---------------------------------------------------------------------------
# Tiled fallback, phase 1: per-(batch, channel) spatial sum with a masked tail.
# ---------------------------------------------------------------------------
def _pool_sum_kernel(x_ref, sum_ref, *, hw, tile_hw, masked_tail):
    h = pl.program_id(1)

    @pl.when(h == 0)
    def _():
        sum_ref[...] = jnp.zeros_like(sum_ref)

    if masked_tail:
        last = pl.num_programs(1) - 1

        @pl.when(h != last)
        def _():
            sum_ref[...] += jnp.sum(x_ref[...], axis=-1, keepdims=True,
                                    dtype=jnp.float32)

        @pl.when(h == last)
        def _():
            # Last block is partially out of bounds: mask the garbage lanes.
            lane = jax.lax.broadcasted_iota(jnp.int32, x_ref.shape, 1)
            valid = (h * tile_hw + lane) < hw
            xm = jnp.where(valid, x_ref[...].astype(jnp.float32), 0.0)
            sum_ref[...] += jnp.sum(xm, axis=-1, keepdims=True)
    else:
        sum_ref[...] += jnp.sum(x_ref[...], axis=-1, keepdims=True,
                                dtype=jnp.float32)


# ---------------------------------------------------------------------------
# Tiled fallback, phase 2: broadcast multiply (OOB tail stores are dropped).
# ---------------------------------------------------------------------------
def _scale_kernel(x_ref, attn_ref, o_ref):
    o_ref[...] = x_ref[...] * attn_ref[...]


def eca_forward(x, conv_w, *, block_budget_bytes=None, vmem_limit_bytes=None):
    """x: (B, C, H, W). conv_w: (1, 1, k) Conv1d weight (no bias)."""
    B, C, H, W = x.shape
    HW = H * W
    k = conv_w.shape[-1]
    pad = k // 2
    itemsize = jnp.dtype(x.dtype).itemsize

    default_budget, default_limit = _chip_vmem_params()
    budget = default_budget if block_budget_bytes is None else block_budget_bytes
    vmem_limit = default_limit if vmem_limit_bytes is None else vmem_limit_bytes

    x3 = x.reshape(B, C, HW)                       # free reshape (merge minor dims)
    w = conv_w.reshape(-1).astype(jnp.float32)     # (k,)
    slab_bytes = C * HW * itemsize

    if slab_bytes <= budget:
        # ---- fused single-pass path: 1 HBM read + 1 HBM write of x ----------
        out3 = pl.pallas_call(
            functools.partial(_eca_fused_kernel, inv_hw=1.0 / HW, k=k, pad=pad),
            out_shape=jax.ShapeDtypeStruct((B, C, HW), x.dtype),
            grid_spec=pltpu.PrefetchScalarGridSpec(
                num_scalar_prefetch=0,
                grid=(B,),
                in_specs=[
                    pl.BlockSpec(memory_space=pltpu.MemorySpace.SMEM),   # conv weights
                    pl.BlockSpec((pl.Squeezed(), C, HW), lambda b: (b, 0, 0)),
                ],
                out_specs=pl.BlockSpec((pl.Squeezed(), C, HW), lambda b: (b, 0, 0)),
            ),
            compiler_params=pltpu.CompilerParams(
                dimension_semantics=("parallel",),
                vmem_limit_bytes=vmem_limit),
            cost_estimate=pl.CostEstimate(
                flops=int(2 * B * C * HW + 2 * B * C * k),
                transcendentals=int(B * C),
                bytes_accessed=int(2 * B * C * HW * itemsize)),
        )(w, x3)
        return out3.reshape(B, C, H, W)

    # ---- tiled two-phase fallback (large per-batch slabs) --------------------
    per_lane_bytes = max(1, C * itemsize)
    tile_hw = max(LANE, (budget // per_lane_bytes) // LANE * LANE)   # multiple of 128
    tile_hw = min(tile_hw, pl.cdiv(HW, LANE) * LANE)
    n_hw = pl.cdiv(HW, tile_hw)
    masked_tail = (HW % tile_hw) != 0

    # phase 1: channel sums over the spatial axis (fp32 accumulator block).
    sums = pl.pallas_call(
        functools.partial(_pool_sum_kernel, hw=HW, tile_hw=tile_hw,
                          masked_tail=masked_tail),
        out_shape=jax.ShapeDtypeStruct((B, C, 1), jnp.float32),
        grid_spec=pltpu.PrefetchScalarGridSpec(
            num_scalar_prefetch=0,
            grid=(B, n_hw),
            in_specs=[pl.BlockSpec((pl.Squeezed(), C, tile_hw),
                                   lambda b, h: (b, 0, h))],
            out_specs=pl.BlockSpec((pl.Squeezed(), C, 1),
                                   lambda b, h: (b, 0, 0)),
        ),
        compiler_params=pltpu.CompilerParams(
            dimension_semantics=("parallel", "arbitrary"),
            vmem_limit_bytes=vmem_limit),
        cost_estimate=pl.CostEstimate(
            flops=int(B * C * HW),
            transcendentals=0,
            bytes_accessed=int(B * C * HW * itemsize + B * C * 4)),
    )(x3)

    # glue: mean, k-tap channel conv, sigmoid on the tiny (B, C) vector.
    y = sums[:, :, 0] * (1.0 / HW)
    ypad = jnp.pad(y, ((0, 0), (pad, pad)))
    conv = sum(w[j] * ypad[:, j:j + C] for j in range(k))
    attn = jax.nn.sigmoid(conv).astype(x.dtype)[:, :, None]          # (B, C, 1)

    # phase 2: tiled broadcast multiply (no padded copy, no output slice).
    out3 = pl.pallas_call(
        _scale_kernel,
        out_shape=jax.ShapeDtypeStruct((B, C, HW), x.dtype),
        grid_spec=pltpu.PrefetchScalarGridSpec(
            num_scalar_prefetch=0,
            grid=(B, n_hw),
            in_specs=[
                pl.BlockSpec((pl.Squeezed(), C, tile_hw), lambda b, h: (b, 0, h)),
                pl.BlockSpec((pl.Squeezed(), C, 1), lambda b, h: (b, 0, 0)),
            ],
            out_specs=pl.BlockSpec((pl.Squeezed(), C, tile_hw),
                                   lambda b, h: (b, 0, h)),
        ),
        compiler_params=pltpu.CompilerParams(
            dimension_semantics=("parallel", "parallel"),
            vmem_limit_bytes=vmem_limit),
        cost_estimate=pl.CostEstimate(
            flops=int(B * C * HW),
            transcendentals=0,
            bytes_accessed=int(2 * B * C * HW * itemsize)),
    )(x3, attn)

    return out3.reshape(B, C, H, W)


def eca_reference(x, conv_w):
    """Pure-JAX reference mirroring the PyTorch forward."""
    B, C, H, W = x.shape
    k = conv_w.shape[-1]
    pad = k // 2
    y = jnp.mean(x.astype(jnp.float32), axis=(2, 3))          # (B, C)
    ypad = jnp.pad(y, ((0, 0), (pad, pad)))
    w = conv_w.reshape(-1).astype(jnp.float32)
    conv = sum(w[j] * ypad[:, j:j + C] for j in range(k))
    attn = jax.nn.sigmoid(conv).astype(x.dtype)[:, :, None, None]
    return x * attn


if __name__ == "__main__":
    key = jax.random.PRNGKey(0)
    kx, kw, kx2 = jax.random.split(key, 3)

    B, C, H, W = 2, 16, 16, 16           # C=16 -> t=2 -> k=3, padding=1
    k = eca_kernel_size(C)
    bound = 1.0 / math.sqrt(k)
    x = jax.random.normal(kx, (B, C, H, W), dtype=jnp.float32)
    conv_w = jax.random.uniform(kw, (1, 1, k), dtype=jnp.float32,
                                minval=-bound, maxval=bound)

    # 1) fused single-pass path (slab fits VMEM budget).
    out = jax.block_until_ready(jax.jit(eca_forward)(x, conv_w))
    ref = eca_reference(x, conv_w)
    assert out.shape == x.shape and out.dtype == x.dtype
    assert jnp.allclose(out, ref, atol=1e-5, rtol=1e-5), (
        float(jnp.max(jnp.abs(out - ref))))

    # 2) tiled two-phase fallback with a masked spatial tail (budget forced tiny).
    H2 = W2 = 13                          # HW = 169 -> one 128-wide tile + 41 tail
    x2 = jax.random.normal(kx2, (B, C, H2, W2), dtype=jnp.float32)
    fwd_tiled = jax.jit(functools.partial(eca_forward, block_budget_bytes=2048))
    out2 = jax.block_until_ready(fwd_tiled(x2, conv_w))
    ref2 = eca_reference(x2, conv_w)
    assert out2.shape == x2.shape and out2.dtype == x2.dtype
    assert jnp.allclose(out2, ref2, atol=1e-5, rtol=1e-5), (
        float(jnp.max(jnp.abs(out2 - ref2))))

    print("KERNEL_OK")
</pallas_src>

<mosaic_0001>
module attributes {stable_mosaic.version = 11 : i64} {
  func.func @_eca_fused_kernel(%arg0: i32, %arg1: memref<3xf32, #tpu.memory_space<smem>>, %arg2: memref<1x16x256xf32, #tpu.memory_space<vmem>>, %arg3: memref<1x16x256xf32, #tpu.memory_space<vmem>>) attributes {dimension_semantics = [#tpu.dimension_semantics<parallel>], iteration_bounds = array<i64: 2>, scalar_prefetch = 0 : i64, scratch_operands = 0 : i64, tpu.core_type = #tpu.core_type<tc>, window_params = [{transform_indices = @transform_0, window_bounds = array<i64: 3>}, {transform_indices = @transform_1, window_bounds = array<i64: 1, 16, 256>}, {transform_indices = @transform_2, window_bounds = array<i64: 1, 16, 256>}]} {
    %c0 = arith.constant 0 : index
    %c0_0 = arith.constant 0 : index
    %c0_1 = arith.constant 0 : index
    %0 = vector.load %arg2[%c0, %c0_0, %c0_1] : memref<1x16x256xf32, #tpu.memory_space<vmem>>, vector<1x16x256xf32>
    %1 = vector.shape_cast %0 : vector<1x16x256xf32> to vector<16x256xf32>
    %cst = arith.constant dense<0.000000e+00> : vector<16xf32>
    %2 = vector.multi_reduction <add>, %1, %cst [1] : vector<16x256xf32> to vector<16xf32>
    %3 = vector.shape_cast %2 : vector<16xf32> to vector<16x1xf32>
    %cst_2 = arith.constant 3.906250e-03 : f32
    %4 = vector.broadcast %cst_2 : f32 to vector<16x1xf32>
    %5 = arith.mulf %3, %4 : vector<16x1xf32>
    %cst_3 = arith.constant 0.000000e+00 : f32
    %6 = vector.broadcast %cst_3 : f32 to vector<16x1xf32>
    %c0_4 = arith.constant 0 : index
    %7 = memref.load %arg1[%c0_4] : memref<3xf32, #tpu.memory_space<smem>>
    %cst_5 = arith.constant 0.000000e+00 : f32
    %8 = vector.broadcast %cst_5 : f32 to vector<1x1xf32>
    %9 = vector.extract_strided_slice %5 {offsets = [0, 0], sizes = [15, 1], strides = [1, 1]} : vector<16x1xf32> to vector<15x1xf32>
    %10 = tpu.concatenate %8, %9 in 0 : vector<1x1xf32>, vector<15x1xf32> -> vector<16x1xf32>
    %11 = vector.broadcast %7 : f32 to vector<16x1xf32>
    %12 = arith.mulf %11, %10 : vector<16x1xf32>
    %13 = arith.addf %6, %12 : vector<16x1xf32>
    %c1 = arith.constant 1 : index
    %14 = memref.load %arg1[%c1] : memref<3xf32, #tpu.memory_space<smem>>
    %15 = vector.broadcast %14 : f32 to vector<16x1xf32>
    %16 = arith.mulf %15, %5 : vector<16x1xf32>
    %17 = arith.addf %13, %16 : vector<16x1xf32>
    %c2 = arith.constant 2 : index
    %18 = memref.load %arg1[%c2] : memref<3xf32, #tpu.memory_space<smem>>
    %cst_6 = arith.constant 0.000000e+00 : f32
    %19 = vector.broadcast %cst_6 : f32 to vector<1x1xf32>
    %20 = vector.extract_strided_slice %5 {offsets = [1, 0], sizes = [15, 1], strides = [1, 1]} : vector<16x1xf32> to vector<15x1xf32>
    %21 = tpu.concatenate %20, %19 in 0 : vector<15x1xf32>, vector<1x1xf32> -> vector<16x1xf32>
    %22 = vector.broadcast %18 : f32 to vector<16x1xf32>
    %23 = arith.mulf %22, %21 : vector<16x1xf32>
    %24 = arith.addf %17, %23 : vector<16x1xf32>
    %cst_7 = arith.constant 0.000000e+00 : f32
    %25 = vector.broadcast %cst_7 : f32 to vector<16x1xf32>
    %26 = arith.subf %25, %24 : vector<16x1xf32>
    %27 = math.exp %26 : vector<16x1xf32>
    %cst_8 = arith.constant 1.000000e+00 : f32
    %28 = vector.broadcast %cst_8 : f32 to vector<16x1xf32>
    %29 = arith.addf %28, %27 : vector<16x1xf32>
    %cst_9 = arith.constant 1.000000e+00 : f32
    %30 = vector.broadcast %cst_9 : f32 to vector<16x1xf32>
    %31 = arith.divf %30, %29 : vector<16x1xf32>
    %c0_10 = arith.constant 0 : index
    %c0_11 = arith.constant 0 : index
    %c0_12 = arith.constant 0 : index
    %32 = vector.load %arg2[%c0_10, %c0_11, %c0_12] : memref<1x16x256xf32, #tpu.memory_space<vmem>>, vector<1x16x256xf32>
    %33 = vector.shape_cast %32 : vector<1x16x256xf32> to vector<16x256xf32>
    %34 = vector.broadcast %31 : vector<16x1xf32> to vector<16x256xf32>
    %35 = arith.mulf %33, %34 : vector<16x256xf32>
    %c0_13 = arith.constant 0 : index
    %c0_14 = arith.constant 0 : index
    %c0_15 = arith.constant 0 : index
    %36 = vector.load %arg3[%c0_13, %c0_14, %c0_15] : memref<1x16x256xf32, #tpu.memory_space<vmem>>, vector<1x16x256xf32>
    %37 = vector.shape_cast %36 : vector<1x16x256xf32> to vector<16x256xf32>
    %38 = vector.shape_cast %35 : vector<16x256xf32> to vector<1x16x256xf32>
    tpu.vector_store %arg3[%c0_13, %c0_14, %c0_15], %38 {strides = array<i32>} : memref<1x16x256xf32, #tpu.memory_space<vmem>>, vector<1x16x256xf32>,
    return
  }
  func.func @transform_0(%arg0: i32) -> i32 {
    %c0_i32 = arith.constant 0 : i32
    %c0_i32_0 = arith.constant 0 : i32
    return %c0_i32 : i32
  }
  func.func @transform_1(%arg0: i32) -> (i32, i32, i32) {
    %c0_i32 = arith.constant 0 : i32
    %c0_i32_0 = arith.constant 0 : i32
    %c0_i32_1 = arith.constant 0 : i32
    return %arg0, %c0_i32, %c0_i32_0 : i32, i32, i32
  }
  func.func @transform_2(%arg0: i32) -> (i32, i32, i32) {
    %c0_i32 = arith.constant 0 : i32
    %c0_i32_0 = arith.constant 0 : i32
    %c0_i32_1 = arith.constant 0 : i32
    return %arg0, %c0_i32, %c0_i32_0 : i32, i32, i32
  }
}

</mosaic_0001>

<bundles_post_ra>
// kernel: eca_forward.1
= control target key start
LH: loop header
LB: loop body
LE: loop exit
PB: predicated region body
PF: predicated region fallthrough
CT: control target
= control target key end

     0   :  { %7 = vsyncpa [#allocation3], 0  ;;  %s418_s9 = smov 0   ;;  %s461_s0 = inlined_call_operand.vmem [shape: f32[3], index: 0, kind: input, shape index: {}]   ;;  %s462_s1 = inlined_call_operand.vmem [shape: f32[2,16,256], index: 1, kind: input, shape index: {}]   ;;  %s463_s2 = inlined_call_operand.vmem [shape: f32[2,16,256], index: 2, kind: output, shape index: {}]  }
   0x1 LB: > { %s327_s10 = sadd.s32 4294967295, %s399_s9   ;;  %p329_p0 = scmp.ge.s32.totalorder %s399_s9, 1  ;;  %s399_s9 = sphi %s418_s9, %s13_s9  }
   0x2   : > { %p91_p1 = scmp.lt.s32.totalorder %s399_s9, 3  ;;  %s103_s13 = sshll.u32 %s461_s0, 4  ;;  %s104_s13 = int_to_ptr.vmem [resolvable:$true] %s103_s13 }
   0x3   : > { %p352_p3 = scmp.eq.s32.totalorder %s327_s10, 0  ;;  %s401_s14 = smov [#allocation2]  }
   0x4   : > { %p92_p2 = pnand %p329_p0, %p91_p1 }
   0x6   : > { %p348_p4 = pneg %p92_p2  ;;  %124 = sbr.rel (%p92_p2) target bundleno = 312 (0x138), region = 28 }
   0x8   : > { %p349_p5 = pnand %p352_p3, %p348_p4 }
   0xa   : > { %351 = dma.vmem_to_smem (!%p349_p5), %s104_s13, 16, %s401_s14, [#allocation3]  }
   0xb   : > { %394 = dma.done.wait (%p352_p3), [#allocation3], 16  }
   0xc   : > { %396 = vsyncadd (%p352_p3), [#allocation3], 4294967280 }
   0xd   : > { %131 = sfence }
   0xe   : > { %p148_p6 = scmp.lt.s32.totalorder %s327_s10, 1  ;;  %s170_s19 = sld [smem:[#allocation2]]  ;;  %v402_v8 = vmov 0   ;;  %vm173_vm0 = vcmask 1040384   ;;  %vm192_vm1 = vcmask 1046528  }
   0xf   : > { %s338_s20 = sld [smem:[#allocation2 + $0x1]]  ;;  %364 = vset.pattern.permute.xlu1 %v402_v8  ;;  %365 = vset.pattern.permute.xlu0 %v402_v8 }
  0x10   : > { %s465_s10 = smov (!%p148_p6, %s327_s10), 1  ;;  %s339_s21 = sld [smem:[#allocation2 + $0x2]] }
  0x11   : > { %s342_s15 = sshll.u32 %s465_s10, 5 }
  0x12   : > { %s152_s18 = scalar_lea.vmem %s462_s1, %s342_s15  ;;  %s157_s24 = scalar_lea.vmem %s463_s2, %s342_s15 }
  0x13   : > { %v437_v0 = vld [vmem:[%s152_s18] sm:$0xff]  ;;  %v439_v1 = vld [vmem:[%s152_s18 + $0x8] sm:$0xff]  ;;  %v443_v3 = vld [vmem:[%s152_s18 + $0x10] sm:$0xff] }
  0x14   : > { %v162_v2 = vadd.f32 %v439_v1, %v437_v0  ;;  %v445_v4 = vld [vmem:[%s152_s18 + $0x18] sm:$0xff]  ;;  %v180_v10 = vstv %s170_s19 }
  0x15   : > { %v165_v5 = vadd.f32 %v445_v4, %v443_v3  ;;  %v186_v13 = vstv %s338_s20 }
  0x16   : > { %163 = vadd.xlane.f32.xlu0 %v162_v2  ;;  %v199_v17 = vstv %s339_s21 }
  0x1e   : > { %166 = vadd.xlane.f32.xlu0 %v165_v5 }
  0x89   : > { %v164_v6 = vpop.xlane.xlu0 %163 }
  0x8a   : > { %v168_v7 = vmul.f32 0.00390625, %v164_v6 }
  0x8c   : > { %v174_v9 = vrot.slane %v168_v7, 7  ;;  %v193_v16 = vrot.slane %v168_v7, 1  ;;  %v187_v20 = vmul.f32 %v186_v13, %v168_v7 }
  0x8e   : > { %v179_v11 = vsel %vm173_vm0, 0.0, %v174_v9 }
  0x8f   : > { %v181_v15 = vmul.f32 %v180_v10, %v179_v11 }
  0x91   : > { %v167_v12 = vpop.xlane.xlu0 %166  ;;  %v189_v24 = vadd.f32 %v187_v20, %v181_v15 }
  0x92   : > { %v169_v14 = vmul.f32 0.00390625, %v167_v12 }
  0x94   : > { %v175_v18 = vrot.slane %v169_v14, 7  ;;  %v194_v19 = vrot.slane %v169_v14, 1  ;;  %v188_v26 = vmul.f32 %v186_v13, %v169_v14 }
  0x96   : > { %v176_v21 = vsel %vm173_vm0, %v174_v9, %v175_v18  ;;  %v195_v22 = vsel %vm192_vm1, %v193_v16, %v194_v19  ;;  %v198_v23 = vsel %vm192_vm1, %v194_v19, 0.0 }
  0x97   : > { %v182_v25 = vmul.f32 %v180_v10, %v176_v21  ;;  %v200_v27 = vmul.f32 %v199_v17, %v195_v22  ;;  %v201_v29 = vmul.f32 %v199_v17, %v198_v23 }
  0x99   : > { %v190_v28 = vadd.f32 %v188_v26, %v182_v25  ;;  %v202_v30 = vadd.f32 %v200_v27, %v189_v24 }
  0x9b   : > { %v203_v31 = vadd.f32 %v201_v29, %v190_v28  ;;  %v204_v32 = vsub.f32 0.0, %v202_v30 }
  0x9d   : > { %v205_v33 = vsub.f32 0.0, %v203_v31  ;;  %v206_v34 = vmul.f32 1.442695, %v204_v32 }
  0x9f   : > { %366 = vpow2.f32 %v206_v34  ;;  %v208_v35 = vmul.f32 1.442695, %v205_v33 }
  0xa1   : > { %368 = vpow2.f32 %v208_v35 }
  0xa5   : > { %v367_v36 = vpop.eup %366 }
  0xa6   : > { %v210_v37 = vadd.f32 1.0, %v367_v36 }
  0xa7   : > { %v369_v38 = vpop.eup %368 }
  0xa8   : > { %v211_v39 = vadd.f32 1.0, %v369_v38  ;;  %370 = vrcp.f32 %v210_v37  ;;  %v223_v45 = vand.u32 2147483648, %v210_v37  ;;  %v221_v47 = vand.u32 2147483647, %v210_v37 }
  0xa9   : > { %vm217_vm3 = vweird.f32 %v210_v37 }
  0xaa   : > { %372 = vrcp.f32 %v211_v39  ;;  %v224_v51 = vor.u32 1.1754944e-38, %v223_v45  ;;  %vm222_vm5 = vcmp.eq.f32.partialorder %v221_v47, 8.507059e+37  ;;  %v238_v55 = vand.u32 2147483648, %v211_v39 }
  0xab   : > { %vm232_vm7 = vweird.f32 %v211_v39  ;;  %v236_v56 = vand.u32 2147483647, %v211_v39 }
  0xac   : > { %v239_v58 = vor.u32 1.1754944e-38, %v238_v55 }
  0xad   : > { %vm237_vm9 = vcmp.eq.f32.partialorder %v236_v56, 8.507059e+37 }
  0xae   : > { %v371_v40 = vpop.eup %370 }
  0xaf   : > { %v213_v41 = vmul.f32 %v371_v40, %v210_v37  ;;  %vm218_vm2 = vweird.f32 %v371_v40 }
  0xb0   : > { %v373_v42 = vpop.eup %372  ;;  %vm219_vm4 = vmor %vm217_vm3, %vm218_vm2 }
  0xb1   : > { %v214_v43 = vsub.f32 1.0, %v213_v41  ;;  %v228_v44 = vmul.f32 %v373_v42, %v211_v39  ;;  %vm233_vm6 = vweird.f32 %v373_v42 }
  0xb2   : > { %vm234_vm8 = vmor %vm232_vm7, %vm233_vm6 }
  0xb3   : > { %v215_v46 = vmul.f32 %v371_v40, %v214_v43  ;;  %v229_v48 = vsub.f32 1.0, %v228_v44 }
  0xb5   : > { %v216_v49 = vadd.f32 %v371_v40, %v215_v46  ;;  %v230_v50 = vmul.f32 %v373_v42, %v229_v48 }
  0xb7   : > { %v220_v52 = vsel %vm219_vm4, %v371_v40, %v216_v49  ;;  %v231_v54 = vadd.f32 %v373_v42, %v230_v50 }
  0xb8   : > { %v225_v53 = vsel %vm222_vm5, %v224_v51, %v220_v52 }
  0xb9   : > { %244 = vperm.xlu1 %364, %v225_v53   ;;  %v235_v57 = vsel %vm234_vm8, %v373_v42, %v231_v54 }
  0xba   : > { %v240_v59 = vsel %vm237_vm9, %v239_v58, %v235_v57 }
  0xc1   : > { %249 = vperm.xlu1 %364, %v240_v59  }
 0x12b   : > { %v245_v60 = vpop.permute.xlu1 %244 }
 0x12c   : > { %v252_v61 = vmul.f32 %v245_v60, %v437_v0  ;;  %v253_v62 = vmul.f32 %v245_v60, %v439_v1 }
 0x12e   : > { %256 = vst [vmem:[%s157_s24] sm:$0xff] %v252_v61 }
 0x12f   : > { %257 = vst [vmem:[%s157_s24 + $0x8] sm:$0xff] %v253_v62 }
 0x133   : > { %v250_v63 = vpop.permute.xlu1 %249 }
 0x134   : > { %v254_v2 = vmul.f32 %v250_v63, %v443_v3  ;;  %v255_v5 = vmul.f32 %v250_v63, %v445_v4 }
 0x136   : > { %258 = vst [vmem:[%s157_s24 + $0x10] sm:$0xff] %v254_v2 }
 0x137   : > { %259 = vst [vmem:[%s157_s24 + $0x18] sm:$0xff] %v255_v5 }
 0x138 PF: > { %s13_s9 = sadd.s32 1, %s399_s9  }
 0x139   : > { %p10_p7 = scmp.ge.s32.totalorder %s13_s9, 4  }
 0x13b   :  { %12 = sbr.rel (!%p10_p7) target bundleno = 1 (0x1), region = 63 }
 0x140   :  { %281 = vsyncpa [#allocation3], 1 }
 0x141   :  { %283 = vsyncpa [#allocation3 + $0x1], 1 }

</bundles_post_ra>
